<compile_context>
chip_gen: v6e
topology: v6e:2x2x1
jax: 0.10.0
libtpu: 0.0.40
codegen_flags: <defaults>
</compile_context>

<pallas_src>
import functools

import jax
import jax.numpy as jnp
import numpy as np
from jax.experimental import pallas as pl
from jax.experimental.pallas import tpu as pltpu


def _round_up(v, m):
    return ((v + m - 1) // m) * m


def _encoder_kernel_packed(x_ref, w_ref, p_ref, seg_ref, o_ref, *, eps, inv_n):
    """Lane-packed path: k = 128 // D_out rows packed per lane-row.

    x_ref:   (TILE_M, k*D_in)    packed row tile (streamed)
    w_ref:   (k*D_in, k*D_out)   block-diagonal weight (resident)
    p_ref:   (3, k*D_out)        [bias, ln_weight, ln_bias] tiled k times (resident, f32)
    seg_ref: (k*D_out, k*D_out)  block-diagonal ones matrix = MXU segmented-sum (resident, f32)
    o_ref:   (TILE_M, k*D_out)   packed output tile (lane-dense: k*D_out == 128)
    """
    x = x_ref[...]
    w = w_ref[...]
    p = p_ref[...]
    seg = seg_ref[...]
    bias, gamma, beta = p[0:1, :], p[1:2, :], p[2:3, :]

    # Linear: MXU matmul with f32 accumulator.  The zero off-diagonal blocks of the
    # packed weight waste MXU flops, but this kernel is HBM-bound (MXU has slack).
    h = jnp.dot(x, w, preferred_element_type=jnp.float32) + bias

    # Segmented LayerNorm: multiplying by the block-diagonal ones matrix broadcasts each
    # D_out-wide segment's sum to every lane of that segment (idle MXU instead of XLU
    # lane shuffles).  All statistics stay in f32.
    mean = jnp.dot(h, seg, preferred_element_type=jnp.float32) * inv_n
    centered = h - mean
    var = jnp.dot(centered * centered, seg, preferred_element_type=jnp.float32) * inv_n
    inv_std = jax.lax.rsqrt(var + eps)
    normed = centered * inv_std * gamma + beta

    # ReLU (Dropout is identity at inference); cast only at the store.
    o_ref[...] = jnp.maximum(normed, 0.0).astype(o_ref.dtype)
    # TODO(synk): training-mode dropout (stochastic masking) not implemented.


def _encoder_kernel_plain(x_ref, w_ref, p_ref, o_ref, *, eps):
    """Plain path: D_out is already a lane-dense width (>= 128) or not a divisor of 128."""
    x = x_ref[...]
    w = w_ref[...]
    p = p_ref[...]
    bias, gamma, beta = p[0:1, :], p[1:2, :], p[2:3, :]

    h = jnp.dot(x, w, preferred_element_type=jnp.float32) + bias
    mean = jnp.mean(h, axis=-1, keepdims=True)
    centered = h - mean
    var = jnp.mean(centered * centered, axis=-1, keepdims=True)
    inv_std = jax.lax.rsqrt(var + eps)
    normed = centered * inv_std * gamma + beta
    o_ref[...] = jnp.maximum(normed, 0.0).astype(o_ref.dtype)


def _vmem_target_bytes():
    """Half of physical VMEM: ~64 MiB on 128 MiB parts (v5e/v6e), ~32 MiB on v7x."""
    try:
        phys = int(pltpu.get_tpu_info().vmem_capacity_bytes)
    except Exception:
        phys = 64 << 20  # assume the smallest generation if the query fails
    return max(phys // 2, 16 << 20)


def item_encoder_forward(x, w, b, gamma, beta, *, eps=1e-5, tile_m=None):
    """x: (B, S, D_in) -> (B, S, D_out).  w is (D_in, D_out) (PyTorch weight transposed)."""
    B, S, D_in = x.shape
    D_out = w.shape[1]
    M = B * S
    out_dtype = x.dtype

    # Lane packing factor: when D_out < 128 divides 128, pack k rows per 128-lane row so
    # every VPU op and every output store is lane-dense.
    if D_out < 128 and 128 % D_out == 0:
        k = 128 // D_out
    else:
        k = 1
        # TODO(synk): D_out < 128 that does not divide 128 falls back to the lane-sparse
        # plain path; a masked/padded-segment variant could cover it.

    x2d = x.reshape(M, D_in)
    M_pad = _round_up(M, k)
    if M_pad != M:
        # Zero rows: LN of an all-zero row stays finite (var=0 -> rsqrt(eps)); sliced off below.
        x2d = jnp.pad(x2d, ((0, M_pad - M), (0, 0)))
    Mp = M_pad // k
    Din_p, Dout_p = k * D_in, k * D_out
    xp = x2d.reshape(Mp, Din_p)  # pure row-major regrouping (no data movement)

    if k > 1:
        wp = jnp.kron(jnp.eye(k, dtype=w.dtype), w)  # (k*D_in, k*D_out) block-diagonal
        seg = jnp.kron(jnp.eye(k, dtype=jnp.float32),
                       jnp.ones((D_out, D_out), jnp.float32))
    else:
        wp, seg = w, None

    # bias / ln_weight / ln_bias folded into one resident (3, k*D_out) f32 operand.
    params = jnp.stack([
        jnp.tile(b.astype(jnp.float32), k),
        jnp.tile(gamma.astype(jnp.float32), k),
        jnp.tile(beta.astype(jnp.float32), k),
    ])

    # ---- tile sizing against a generation-aware VMEM budget ----
    x_bytes = jnp.dtype(x.dtype).itemsize
    o_bytes = jnp.dtype(out_dtype).itemsize
    w_bytes = jnp.dtype(w.dtype).itemsize
    row_align = 8 if x_bytes >= 4 else (16 if x_bytes == 2 else 32)

    target = _vmem_target_bytes()
    # Residents counted double-buffered (worst case) + per-row streaming tiles + f32 temps.
    fixed = 2 * (Din_p * Dout_p * w_bytes + 3 * Dout_p * 4
                 + (Dout_p * Dout_p * 4 if k > 1 else 0))
    per_row = (2 * Din_p * x_bytes          # double-buffered x tile
               + 2 * Dout_p * o_bytes       # double-buffered out tile
               + 4 * Dout_p * 4)            # f32 intermediates (h / centered / normed / stats)
    budget_rows = int((target / 1.25 - fixed) // per_row)

    if tile_m is None:
        tile_m = 1024
    tile_m = max(row_align, min(int(tile_m), max(budget_rows, row_align), 2048))
    # Keep the row grid at >= 2 steps when possible so both v7x TensorCores get work.
    if Mp >= 2 * row_align:
        tile_m = min(tile_m, _round_up(pl.cdiv(Mp, 2), row_align))
    tile_m = max(row_align, (tile_m // row_align) * row_align)
    if tile_m >= Mp:
        tile_m = Mp  # full-extent block is always legal
    grid_m = pl.cdiv(Mp, tile_m)

    needed = fixed + tile_m * per_row
    vmem_limit = int(min(max(int(needed * 1.25), 8 << 20), 100 << 20))

    # Single-buffer resident operands when they are big enough to matter (saves a full
    # extra copy of W in VMEM on v7x); keep default pipelining for tiny operands.
    big_resident = Din_p * Dout_p * w_bytes > (1 << 20)
    resident_kwargs = dict(pipeline_mode=pl.Buffered(1)) if big_resident else {}

    in_specs = [
        pl.BlockSpec((tile_m, Din_p), lambda i: (i, 0)),                     # x: row-tiled
        pl.BlockSpec((Din_p, Dout_p), lambda i: (0, 0), **resident_kwargs),  # W: resident
        pl.BlockSpec((3, Dout_p), lambda i: (0, 0)),                         # params: resident
    ]
    args = [xp, wp, params]
    if k > 1:
        in_specs.append(pl.BlockSpec((Dout_p, Dout_p), lambda i: (0, 0), **resident_kwargs))
        args.append(seg)
        kernel = functools.partial(_encoder_kernel_packed, eps=eps, inv_n=1.0 / D_out)
    else:
        kernel = functools.partial(_encoder_kernel_plain, eps=eps)

    out = pl.pallas_call(
        kernel,
        out_shape=jax.ShapeDtypeStruct((Mp, Dout_p), out_dtype),
        grid_spec=pl.GridSpec(
            grid=(grid_m,),
            in_specs=in_specs,
            out_specs=pl.BlockSpec((tile_m, Dout_p), lambda i: (i, 0)),
        ),
        compiler_params=pltpu.CompilerParams(
            dimension_semantics=("parallel",),  # independent row tiles
            vmem_limit_bytes=vmem_limit,
        ),
    )(*args)

    out = out.reshape(M_pad, D_out)
    if M_pad != M:
        out = out[:M]
    return out.reshape(B, S, D_out)


def _orthogonal_init(key, rows, cols, gain):
    """Deterministic orthogonal init matching nn.init.orthogonal_ semantics."""
    n, m = rows, cols
    transpose = n < m
    a = jax.random.normal(key, (max(n, m), min(n, m)), dtype=jnp.float32)
    q, r = jnp.linalg.qr(a)
    q = q * jnp.sign(jnp.diagonal(r))[None, :]
    w = q.T if transpose else q
    return gain * w[:n, :m]


def _reference(x, w, b, gamma, beta, eps=1e-5):
    """float64 numpy reference of Linear -> LayerNorm -> ReLU (eval-mode Dropout = id)."""
    x = np.asarray(x, np.float64)
    w = np.asarray(w, np.float64)
    b = np.asarray(b, np.float64)
    g = np.asarray(gamma, np.float64)
    be = np.asarray(beta, np.float64)
    h = x @ w + b
    mu = h.mean(-1, keepdims=True)
    var = ((h - mu) ** 2).mean(-1, keepdims=True)
    return np.maximum((h - mu) / np.sqrt(var + eps) * g + be, 0.0)


if __name__ == "__main__":
    batch, seq, input_dim, output_dim = 2, 8, 16, 32

    key = jax.random.PRNGKey(0)
    k_x, k_w, k_x2, k_w2 = jax.random.split(key, 4)

    def make_params(wkey, d_in, d_out):
        # nn.Linear: weight (out, in) orthogonal(gain=sqrt(2)), bias 0; nn.LayerNorm: w=1, b=0.
        w_torch = _orthogonal_init(wkey, d_out, d_in, gain=float(np.sqrt(2.0)))
        return (jnp.asarray(w_torch).T,                       # (d_in, d_out) for the kernel
                jnp.zeros((d_out,), jnp.float32),
                jnp.ones((d_out,), jnp.float32),
                jnp.zeros((d_out,), jnp.float32))

    # --- Test 1: packed (lane-dense) path, f32 streams, D_out = 32 < 128 ---
    x = jax.random.normal(k_x, (batch, seq, input_dim), dtype=jnp.float32)
    w, b, gamma, beta = make_params(k_w, input_dim, output_dim)
    out = jax.block_until_ready(item_encoder_forward(x, w, b, gamma, beta))
    assert out.shape == (batch, seq, output_dim)
    np.testing.assert_allclose(np.asarray(out, np.float64),
                               _reference(x, w, b, gamma, beta),
                               rtol=1e-4, atol=1e-4)

    # --- Test 2: bf16 streaming dtypes (halved HBM traffic); LN stats stay f32 in-kernel ---
    out_bf16 = jax.block_until_ready(item_encoder_forward(
        x.astype(jnp.bfloat16), w.astype(jnp.bfloat16), b, gamma, beta))
    assert out_bf16.dtype == jnp.bfloat16
    np.testing.assert_allclose(
        np.asarray(out_bf16.astype(jnp.float32), np.float64),
        _reference(x, w, b, gamma, beta), rtol=1e-1, atol=1e-1)

    # --- Test 3: plain path (D_out = 128 already lane-dense), multi-step row grid ---
    d_out2 = 128
    x2 = jax.random.normal(k_x2, (batch, seq, input_dim), dtype=jnp.float32)
    w2, b2, g2, be2 = make_params(k_w2, input_dim, d_out2)
    out2 = jax.block_until_ready(item_encoder_forward(x2, w2, b2, g2, be2))
    assert out2.shape == (batch, seq, d_out2)
    np.testing.assert_allclose(np.asarray(out2, np.float64),
                               _reference(x2, w2, b2, g2, be2),
                               rtol=1e-4, atol=1e-4)

    print("KERNEL_OK")
</pallas_src>

<mosaic_0001>
module attributes {stable_mosaic.version = 11 : i64} {
  func.func @_encoder_kernel_packed(%arg0: i32, %arg1: memref<4x64xf32, #tpu.memory_space<vmem>>, %arg2: memref<64x128xf32, #tpu.memory_space<vmem>>, %arg3: memref<3x128xf32, #tpu.memory_space<vmem>>, %arg4: memref<128x128xf32, #tpu.memory_space<vmem>>, %arg5: memref<4x128xf32, #tpu.memory_space<vmem>>) attributes {dimension_semantics = [#tpu.dimension_semantics<parallel>], iteration_bounds = array<i64: 1>, scalar_prefetch = 0 : i64, scratch_operands = 0 : i64, tpu.core_type = #tpu.core_type<tc>, window_params = [{transform_indices = @transform_0, window_bounds = array<i64: 4, 64>}, {pipeline_mode = #tpu.pipeline_mode<synchronous>, transform_indices = @transform_1, window_bounds = array<i64: 64, 128>}, {pipeline_mode = #tpu.pipeline_mode<synchronous>, transform_indices = @transform_2, window_bounds = array<i64: 3, 128>}, {pipeline_mode = #tpu.pipeline_mode<synchronous>, transform_indices = @transform_3, window_bounds = array<i64: 128, 128>}, {transform_indices = @transform_4, window_bounds = array<i64: 4, 128>}]} {
    %c0 = arith.constant 0 : index
    %c0_0 = arith.constant 0 : index
    %0 = vector.load %arg1[%c0, %c0_0] : memref<4x64xf32, #tpu.memory_space<vmem>>, vector<4x64xf32>
    %c0_1 = arith.constant 0 : index
    %c0_2 = arith.constant 0 : index
    %1 = vector.load %arg2[%c0_1, %c0_2] : memref<64x128xf32, #tpu.memory_space<vmem>>, vector<64x128xf32>
    %c0_3 = arith.constant 0 : index
    %c0_4 = arith.constant 0 : index
    %2 = vector.load %arg3[%c0_3, %c0_4] : memref<3x128xf32, #tpu.memory_space<vmem>>, vector<3x128xf32>
    %c0_5 = arith.constant 0 : index
    %c0_6 = arith.constant 0 : index
    %3 = vector.load %arg4[%c0_5, %c0_6] : memref<128x128xf32, #tpu.memory_space<vmem>>, vector<128x128xf32>
    %4 = vector.extract_strided_slice %2 {offsets = [0, 0], sizes = [1, 128], strides = [1, 1]} : vector<3x128xf32> to vector<1x128xf32>
    %5 = vector.extract_strided_slice %2 {offsets = [1, 0], sizes = [1, 128], strides = [1, 1]} : vector<3x128xf32> to vector<1x128xf32>
    %6 = vector.extract_strided_slice %2 {offsets = [2, 0], sizes = [1, 128], strides = [1, 1]} : vector<3x128xf32> to vector<1x128xf32>
    %cst = arith.constant dense<0.000000e+00> : vector<4x128xf32>
    %7 = tpu.matmul %0, %1, %cst {dimension_numbers = #tpu.dot_dimension_numbers<[1], [0], [0], [1], [0, 0, 1, 1], [], []>} : vector<4x64xf32>, vector<64x128xf32>, vector<4x128xf32> -> vector<4x128xf32>
    %8 = vector.broadcast %4 : vector<1x128xf32> to vector<4x128xf32>
    %9 = arith.addf %7, %8 : vector<4x128xf32>
    %cst_7 = arith.constant dense<0.000000e+00> : vector<4x128xf32>
    %10 = tpu.matmul %9, %3, %cst_7 {dimension_numbers = #tpu.dot_dimension_numbers<[1], [0], [0], [1], [0, 0, 1, 1], [], []>} : vector<4x128xf32>, vector<128x128xf32>, vector<4x128xf32> -> vector<4x128xf32>
    %cst_8 = arith.constant 3.125000e-02 : f32
    %11 = vector.broadcast %cst_8 : f32 to vector<4x128xf32>
    %12 = arith.mulf %10, %11 : vector<4x128xf32>
    %13 = arith.subf %9, %12 : vector<4x128xf32>
    %14 = arith.mulf %13, %13 : vector<4x128xf32>
    %cst_9 = arith.constant dense<0.000000e+00> : vector<4x128xf32>
    %15 = tpu.matmul %14, %3, %cst_9 {dimension_numbers = #tpu.dot_dimension_numbers<[1], [0], [0], [1], [0, 0, 1, 1], [], []>} : vector<4x128xf32>, vector<128x128xf32>, vector<4x128xf32> -> vector<4x128xf32>
    %cst_10 = arith.constant 3.125000e-02 : f32
    %16 = vector.broadcast %cst_10 : f32 to vector<4x128xf32>
    %17 = arith.mulf %15, %16 : vector<4x128xf32>
    %cst_11 = arith.constant 9.99999974E-6 : f32
    %18 = vector.broadcast %cst_11 : f32 to vector<4x128xf32>
    %19 = arith.addf %17, %18 : vector<4x128xf32>
    %20 = math.rsqrt %19 : vector<4x128xf32>
    %21 = arith.mulf %13, %20 : vector<4x128xf32>
    %22 = vector.broadcast %5 : vector<1x128xf32> to vector<4x128xf32>
    %23 = arith.mulf %21, %22 : vector<4x128xf32>
    %24 = vector.broadcast %6 : vector<1x128xf32> to vector<4x128xf32>
    %25 = arith.addf %23, %24 : vector<4x128xf32>
    %cst_12 = arith.constant 0.000000e+00 : f32
    %26 = vector.broadcast %cst_12 : f32 to vector<4x128xf32>
    %27 = arith.maximumf %25, %26 : vector<4x128xf32>
    %c0_13 = arith.constant 0 : index
    %c0_14 = arith.constant 0 : index
    %28 = vector.load %arg5[%c0_13, %c0_14] : memref<4x128xf32, #tpu.memory_space<vmem>>, vector<4x128xf32>
    tpu.vector_store %arg5[%c0_13, %c0_14], %27 {strides = array<i32>} : memref<4x128xf32, #tpu.memory_space<vmem>>, vector<4x128xf32>,
    return
  }
  func.func @transform_0(%arg0: i32) -> (i32, i32) {
    %c0_i32 = arith.constant 0 : i32
    %c0_i32_0 = arith.constant 0 : i32
    return %arg0, %c0_i32 : i32, i32
  }
  func.func @transform_1(%arg0: i32) -> (i32, i32) {
    %c0_i32 = arith.constant 0 : i32
    %c0_i32_0 = arith.constant 0 : i32
    %c0_i32_1 = arith.constant 0 : i32
    return %c0_i32, %c0_i32_0 : i32, i32
  }
  func.func @transform_2(%arg0: i32) -> (i32, i32) {
    %c0_i32 = arith.constant 0 : i32
    %c0_i32_0 = arith.constant 0 : i32
    %c0_i32_1 = arith.constant 0 : i32
    return %c0_i32, %c0_i32_0 : i32, i32
  }
  func.func @transform_3(%arg0: i32) -> (i32, i32) {
    %c0_i32 = arith.constant 0 : i32
    %c0_i32_0 = arith.constant 0 : i32
    %c0_i32_1 = arith.constant 0 : i32
    return %c0_i32, %c0_i32_0 : i32, i32
  }
  func.func @transform_4(%arg0: i32) -> (i32, i32) {
    %c0_i32 = arith.constant 0 : i32
    %c0_i32_0 = arith.constant 0 : i32
    return %arg0, %c0_i32 : i32, i32
  }
}

</mosaic_0001>

<bundles_post_ra>
// kernel: tpu_custom_call.1
= control target key start
LH: loop header
LB: loop body
LE: loop exit
PB: predicated region body
PF: predicated region fallthrough
CT: control target
= control target key end

     0   :  { %9 = vsyncpa [#allocation3], 0  ;;  %s702_s0 = inlined_call_operand.hbm [shape: f32[4,64], index: 0, kind: input, shape index: {}]   ;;  %s703_s1 = inlined_call_operand.hbm [shape: f32[64,128], index: 1, kind: input, shape index: {}]   ;;  %s704_s2 = inlined_call_operand.hbm [shape: f32[3,128], index: 2, kind: input, shape index: {}]   ;;  %s705_s3 = inlined_call_operand.hbm [shape: f32[128,128], index: 3, kind: input, shape index: {}]   ;;  %s706_s4 = inlined_call_operand.hbm [shape: f32[4,128], index: 4, kind: output, shape index: {}]  }
   0x1   :  { %10 = vsyncpa [#allocation6], 0 }
   0x2   :  { %11 = vsyncpa [#allocation9], 0 }
   0x3   :  { %12 = vsyncpa [#allocation4], 0  ;;  %s601_s15 = smov [#allocation5]  }
   0x4   :  { %s28_s16 = sshll.u32 %s601_s15, 4  ;;  %s29_s16 = int_to_ptr.vmem [resolvable:$true] %s28_s16 }
   0x5   :  { %s501_s17 = scalar_lea.vmem %s29_s16, 1024  ;;  %p506_p1 = scmp.lt.s32.totalorder %s29_s16, %s29_s16 }
   0x6   :  { %p502_p0 = scmp.ne.s32.totalorder %s29_s16, %s501_s17  ;;  %p507_p2 = scmp.lt.s32.totalorder %s501_s17, %s501_s17 }
   0x8   :  { %p508_p3 = por %p507_p2, %p506_p1 }
   0xa   :  { %p509_p4 = pnand %p508_p3, %p502_p0 }
   0xc   :  { %512 = shalt.err (!%p509_p4)
}
   0xd   :  { %s602_s18 = smov 128   ;;  %s603_s19 = smov 8  }
   0xe   :  { %34 = dma.hbm_to_vmem [thread:$0]  %s703_s1, 1024, %s29_s16, [#allocation6], %s602_s18, %s602_s18, %s603_s19  }
   0xf   :  { %s604_s22 = smov [#allocation2]   ;;  %s605_s24 = smov [#allocation7]  }
  0x10   :  { %s19_s23 = sshll.u32 %s604_s22, 4  ;;  %s41_s25 = sshll.u32 %s605_s24, 4  ;;  %s20_s23 = int_to_ptr.vmem [resolvable:$true] %s19_s23  ;;  %s42_s25 = int_to_ptr.vmem [resolvable:$true] %s41_s25 }
  0x11   :  { %s521_s26 = scalar_lea.vmem %s20_s23, 64  ;;  %p526_p6 = scmp.lt.s32.totalorder %s20_s23, %s20_s23 }
  0x12   :  { %p522_p5 = scmp.ne.s32.totalorder %s20_s23, %s521_s26  ;;  %p527_p7 = scmp.lt.s32.totalorder %s521_s26, %s521_s26 }
  0x14   :  { %p528_p8 = por %p527_p7, %p526_p6 }
  0x16   :  { %p529_p9 = pnand %p528_p8, %p522_p5 }
  0x18   :  { %532 = shalt.err (!%p529_p9)
}
  0x19   :  { %22 = dma.hbm_to_vmem [thread:$0]  %s702_s0, 64, %s20_s23, [#allocation3]  }
  0x1a   :  { %s541_s29 = scalar_lea.vmem %s42_s25, 64  ;;  %p546_p11 = scmp.lt.s32.totalorder %s42_s25, %s42_s25 }
  0x1b   :  { %p542_p10 = scmp.ne.s32.totalorder %s42_s25, %s541_s29  ;;  %p547_p12 = scmp.lt.s32.totalorder %s541_s29, %s541_s29 }
  0x1d   :  { %p548_p13 = por %p547_p12, %p546_p11 }
  0x1f   :  { %p549_p0 = pnand %p548_p13, %p542_p10 }
  0x21   :  { %552 = shalt.err (!%p549_p0)
}
  0x22   :  { %44 = dma.hbm_to_vmem [thread:$0]  %s704_s2, 64, %s42_s25, [#allocation6]  }
  0x23   :  { %s606_s5 = smov [#allocation8]  }
  0x24   :  { %s50_s6 = sshll.u32 %s606_s5, 4  ;;  %s51_s6 = int_to_ptr.vmem [resolvable:$true] %s50_s6 }
  0x25   :  { %s561_s7 = scalar_lea.vmem %s51_s6, 2048  ;;  %p566_p2 = scmp.lt.s32.totalorder %s51_s6, %s51_s6 }
  0x26   :  { %p562_p1 = scmp.ne.s32.totalorder %s51_s6, %s561_s7  ;;  %p567_p3 = scmp.lt.s32.totalorder %s561_s7, %s561_s7 }
  0x28   :  { %p568_p4 = por %p567_p3, %p566_p2 }
  0x2a   :  { %p569_p5 = pnand %p568_p4, %p562_p1 }
  0x2c   :  { %572 = shalt.err (!%p569_p5)
}
  0x2d   :  { %56 = dma.hbm_to_vmem [thread:$0]  %s705_s3, 2048, %s51_s6, [#allocation9], %s602_s18, %s602_s18, %s603_s19  }
  0x2e   :  { %593 = dma.done.wait [#allocation3], 64  }
  0x2f   :  { %594 = vsyncadd [#allocation3], 4294967232 }
  0x30   :  { %595 = dma.done.wait [#allocation6], 1088  }
  0x31   :  { %596 = vsyncadd [#allocation6], 4294966208 }
  0x32   :  { %597 = dma.done.wait [#allocation9], 2048  }
  0x33   :  { %598 = vsyncadd [#allocation9], 4294965248  ;;  %v607_v0 = vmov 0.0   ;;  %vm608_vm0 = vmmov 0   ;;  %v77_v1 = vld [vmem:[#allocation5 + $0x38] sm:$0xff]  ;;  %v76_v2 = vld [vmem:[#allocation5 + $0x30] sm:$0xff]  ;;  %v95_v26 = vlaneseq }
  0x34   :  { %393 = vmatprep.subr.mxu0 %v607_v0  ;;  %409 = vmatprep.mubr.msk.f32.mxu0 %vm608_vm0, %v607_v0  ;;  %v75_v3 = vld [vmem:[#allocation5 + $0x28] sm:$0xff]  ;;  %v94_v4 = vld [vmem:[#allocation8 + $0x78] sm:$0xff]  ;;  %v93_v5 = vld [vmem:[#allocation8 + $0x70] sm:$0xff]  ;;  %vm99_vm1 = vcmask 523264   ;;  %s609_s2 = smov [#allocation10]  }
  0x35   :  { %412 = vmatprep.subr.mxu1 %v607_v0  ;;  %444 = vmatprep.mubr.msk.f32.mxu1 %vm608_vm0, %v607_v0  ;;  %v74_v6 = vld [vmem:[#allocation5 + $0x20] sm:$0xff]  ;;  %v92_v7 = vld [vmem:[#allocation8 + $0x68] sm:$0xff]  ;;  %v73_v8 = vld [vmem:[#allocation5 + $0x18] sm:$0xff]  ;;  %v96_v27 = vshrl.u32 %v95_v26, 7  ;;  %s338_s3 = sshll.u32 %s609_s2, 4  ;;  %s339_s3 = int_to_ptr.vmem [resolvable:$true] %s338_s3 }
  0x36   :  { %394 = vmatpush3.msra.mxu0 %v77_v1  ;;  %413 = vmatpush3.msra.mxu1 %v94_v4  ;;  %v91_v9 = vld [vmem:[#allocation8 + $0x60] sm:$0xff]  ;;  %v72_v10 = vld [vmem:[#allocation5 + $0x10] sm:$0xff]  ;;  %v90_v11 = vld [vmem:[#allocation8 + $0x58] sm:$0xff]  ;;  %s573_s9 = scalar_lea.vmem %s339_s3, 64  ;;  %p578_p7 = scmp.lt.s32.totalorder %s339_s3, %s339_s3 }
  0x37   :  { %395 = vmatprep.subr.mxu0 %v607_v0  ;;  %414 = vmatprep.subr.mxu1 %v607_v0  ;;  %v71_v12 = vld [vmem:[#allocation5 + $0x8] sm:$0xff]  ;;  %v89_v13 = vld [vmem:[#allocation8 + $0x50] sm:$0xff]  ;;  %v70_v14 = vld [vmem:[#allocation5] sm:$0xff]  ;;  %v97_v28 = vsub.s32 0, %v96_v27  ;;  %v322_v43 = vsub.s32 1, %v96_v27  ;;  %v327_v44 = vsub.s32 2, %v96_v27  ;;  %p574_p6 = scmp.ne.s32.totalorder %s339_s3, %s573_s9  ;;  %p579_p8 = scmp.lt.s32.totalorder %s573_s9, %s573_s9 }
  0x38   :  { %396 = vmatpush3.msra.mxu0 %v76_v2  ;;  %415 = vmatpush3.msra.mxu1 %v93_v5  ;;  %v69_v15 = vld [vmem:[#allocation2] sm:$0xf]  ;;  %v88_v16 = vld [vmem:[#allocation8 + $0x48] sm:$0xff]  ;;  %v87_v17 = vld [vmem:[#allocation8 + $0x40] sm:$0xff] }
  0x39   :  { %397 = vmatprep.subr.mxu0 %v607_v0  ;;  %416 = vmatprep.subr.mxu1 %v607_v0  ;;  %v86_v18 = vld [vmem:[#allocation8 + $0x38] sm:$0xff]  ;;  %v85_v19 = vld [vmem:[#allocation8 + $0x30] sm:$0xff]  ;;  %v84_v20 = vld [vmem:[#allocation8 + $0x28] sm:$0xff]  ;;  %p580_p9 = por %p579_p8, %p578_p7 }
  0x3a   :  { %398 = vmatpush3.msra.mxu0 %v75_v3  ;;  %417 = vmatpush3.msra.mxu1 %v92_v7  ;;  %v83_v21 = vld [vmem:[#allocation8 + $0x20] sm:$0xff]  ;;  %v82_v22 = vld [vmem:[#allocation8 + $0x18] sm:$0xff]  ;;  %v81_v23 = vld [vmem:[#allocation8 + $0x10] sm:$0xff] }
  0x3b   :  { %399 = vmatprep.subr.mxu0 %v607_v0  ;;  %418 = vmatprep.subr.mxu1 %v607_v0  ;;  %v80_v24 = vld [vmem:[#allocation8 + $0x8] sm:$0xff]  ;;  %v79_v25 = vld [vmem:[#allocation8] sm:$0xff]  ;;  %v78_v29 = vld [vmem:[#allocation7] sm:$0x7]  ;;  %p581_p10 = pnand %p580_p9, %p574_p6 }
  0x3c   :  { %400 = vmatpush3.msra.mxu0 %v74_v6  ;;  %419 = vmatpush3.msra.mxu1 %v91_v9  ;;  %v98_v30 = vrot.slane %v78_v29, %v97_v28  ;;  %v323_v45 = vrot.slane %v78_v29, %v322_v43  ;;  %v328_v48 = vrot.slane %v78_v29, %v327_v44 }
  0x3d   :  { %401 = vmatprep.subr.mxu0 %v607_v0  ;;  %420 = vmatprep.subr.mxu1 %v607_v0 }
  0x3e   :  { %402 = vmatpush3.msra.mxu0 %v73_v8  ;;  %421 = vmatpush3.msra.mxu1 %v90_v11 }
  0x3f   :  { %403 = vmatprep.subr.mxu0 %v607_v0  ;;  %422 = vmatprep.subr.mxu1 %v607_v0 }
  0x40   :  { %404 = vmatpush3.msra.mxu0 %v72_v10  ;;  %423 = vmatpush3.msra.mxu1 %v89_v13 }
  0x41   :  { %405 = vmatprep.subr.mxu0 %v607_v0  ;;  %424 = vmatprep.subr.mxu1 %v607_v0 }
  0x42   :  { %406 = vmatpush3.msra.mxu0 %v71_v12  ;;  %425 = vmatpush3.msra.mxu1 %v88_v16 }
  0x43   :  { %407 = vmatprep.subr.mxu0 %v607_v0  ;;  %426 = vmatprep.subr.mxu1 %v607_v0 }
  0x44   :  { %408 = vmatpush3.msra.mxu0 %v70_v14  ;;  %427 = vmatpush3.msra.mxu1 %v87_v17 }
  0x45   :  { %410 = vmatmul.mubr.msk.f32.vlgmr.msra.gmra.mxu0 %vm99_vm1, %v69_v15  ;;  %447 = vmatprep.subr.mxu0 %v607_v0 }
  0x46   :  { %448 = vmatpush3.msra.mxu0 %v94_v4  ;;  %428 = vmatprep.subr.mxu1 %v607_v0 }
  0x47   :  { %449 = vmatprep.subr.mxu0 %v607_v0  ;;  %429 = vmatpush3.msra.mxu1 %v86_v18 }
  0x48   :  { %450 = vmatpush3.msra.mxu0 %v93_v5  ;;  %430 = vmatprep.subr.mxu1 %v607_v0 }
  0x49   :  { %451 = vmatprep.subr.mxu0 %v607_v0  ;;  %431 = vmatpush3.msra.mxu1 %v85_v19 }
  0x4a   :  { %452 = vmatpush3.msra.mxu0 %v92_v7  ;;  %432 = vmatprep.subr.mxu1 %v607_v0 }
  0x4b   :  { %453 = vmatprep.subr.mxu0 %v607_v0  ;;  %433 = vmatpush3.msra.mxu1 %v84_v20 }
  0x4c   :  { %454 = vmatpush3.msra.mxu0 %v91_v9  ;;  %434 = vmatprep.subr.mxu1 %v607_v0 }
  0x4d   :  { %455 = vmatprep.subr.mxu0 %v607_v0  ;;  %435 = vmatpush3.msra.mxu1 %v83_v21 }
  0x4e   :  { %456 = vmatpush3.msra.mxu0 %v90_v11  ;;  %436 = vmatprep.subr.mxu1 %v607_v0 }
  0x4f   :  { %457 = vmatprep.subr.mxu0 %v607_v0  ;;  %437 = vmatpush3.msra.mxu1 %v82_v22 }
  0x50   :  { %458 = vmatpush3.msra.mxu0 %v89_v13  ;;  %438 = vmatprep.subr.mxu1 %v607_v0 }
  0x51   :  { %459 = vmatprep.subr.mxu0 %v607_v0  ;;  %439 = vmatpush3.msra.mxu1 %v81_v23 }
  0x52   :  { %460 = vmatpush3.msra.mxu0 %v88_v16  ;;  %440 = vmatprep.subr.mxu1 %v607_v0 }
  0x53   :  { %461 = vmatprep.subr.mxu0 %v607_v0  ;;  %479 = vmatprep.mubr.msk.f32.mxu0 %vm608_vm0, %v607_v0 }
  0x54   :  { %462 = vmatpush3.msra.mxu0 %v87_v17  ;;  %441 = vmatpush3.msra.mxu1 %v80_v24 }
  0x55   :  { %463 = vmatprep.subr.mxu0 %v607_v0  ;;  %442 = vmatprep.subr.mxu1 %v607_v0 }
  0x56   :  { %464 = vmatpush3.msra.mxu0 %v86_v18  ;;  %443 = vmatpush3.msra.mxu1 %v79_v25 }
  0x57   :  { %465 = vmatprep.subr.mxu0 %v607_v0 }
  0x58   :  { %466 = vmatpush3.msra.mxu0 %v85_v19 }
  0x59   :  { %467 = vmatprep.subr.mxu0 %v607_v0 }
  0x5a   :  { %468 = vmatpush3.msra.mxu0 %v84_v20 }
  0x5b   :  { %469 = vmatprep.subr.mxu0 %v607_v0 }
  0x5c   :  { %470 = vmatpush3.msra.mxu0 %v83_v21 }
  0x5d   :  { %471 = vmatprep.subr.mxu0 %v607_v0 }
  0x5e   :  { %472 = vmatpush3.msra.mxu0 %v82_v22 }
  0x5f   :  { %473 = vmatprep.subr.mxu0 %v607_v0 }
  0x60   :  { %474 = vmatpush3.msra.mxu0 %v81_v23 }
  0x61   :  { %475 = vmatprep.subr.mxu0 %v607_v0 }
  0x62   :  { %476 = vmatpush3.msra.mxu0 %v80_v24 }
  0x63   :  { %477 = vmatprep.subr.mxu0 %v607_v0 }
  0x64   :  { %478 = vmatpush3.msra.mxu0 %v79_v25 }
 0x105   :  { %v169_v31 = vpop.f32.mrf.mxu0 }
 0x106   :  { %v170_v32 = vadd.f32 %v169_v31, %v98_v30 }
 0x107   :  { %v411_v33 = vpop.f32.mrf.mxu0 }
 0x108   :  { %445 = vmatmul.mubr.f32.vlgmr.msra.gmra.mxu1 %v170_v32 }
 0x1c8   :  { %v239_v34 = vpop.f32.mrf.mxu1 }
 0x1c9   :  { %v243_v35 = vmul.f32 0.03125, %v239_v34 }
 0x1ca   :  { %v446_v36 = vpop.f32.mrf.mxu1 }
 0x1cb   :  { %v244_v37 = vsub.f32 %v170_v32, %v243_v35 }
 0x1cd   :  { %v245_v38 = vmul.f32 %v244_v37, %v244_v37 }
 0x1cf   :  { %480 = vmatmul.mubr.f32.vlgmr.msra.gmra.mxu0 %v245_v38 }
 0x28f   :  { %v312_v39 = vpop.f32.mrf.mxu0 }
 0x290   :  { %v316_v40 = vmul.f32 0.03125, %v312_v39 }
 0x291   :  { %v481_v41 = vpop.f32.mrf.mxu0 }
 0x292   :  { %v317_v42 = vadd.f32 1e-05, %v316_v40 }
 0x294   :  { %491 = vrsqrt.f32 %v317_v42 }
 0x2a1   :  { %v492_v46 = vpop.eup %491 }
 0x2a2   :  { %v319_v47 = vmul.f32 %v492_v46, %v244_v37 }
 0x2a4   :  { %v324_v49 = vmul.f32 %v323_v45, %v319_v47 }
 0x2a6   :  { %v329_v50 = vadd.f32 %v328_v48, %v324_v49 }
 0x2a8   :  { %v330_v51 = vmax.f32 %v329_v50, 0.0 }
 0x2aa   :  { %331 = vst [vmem:[#allocation10] sm:$0xf] %v330_v51 }
 0x2ab   :  { %584 = shalt.err (!%p581_p10)
}
 0x2ac   :  { %341 = dma.vmem_to_hbm [thread:$0]  %s339_s3, 64, %s706_s4, [#allocation4]  }
 0x2ad   :  { %599 = dma.done.wait [#allocation4], 64  }
 0x2ae   :  { %600 = vsyncadd [#allocation4], 4294967232 }
 0x2af   :  { %345 = vsyncpa [#allocation3], 1 }
 0x2b0   :  { %346 = vsyncpa [#allocation6], 1 }
 0x2b1   :  { %347 = vsyncpa [#allocation9], 1 }
 0x2b2   :  { %348 = vsyncpa [#allocation4], 1 }

</bundles_post_ra>
